<compile_context>
chip_gen: v7x
topology: tpu7x:2x2x1
jax: 0.10.0
libtpu: 0.0.40
codegen_flags: <defaults>
</compile_context>

<pallas_src>
import math
from functools import partial

import jax
import jax.numpy as jnp
from jax.experimental import pallas as pl
from jax.experimental.pallas import tpu as pltpu


def _round_up(x: int, m: int) -> int:
    return ((x + m - 1) // m) * m


def _pick_tile_n(out_pad: int, max_tile_n: int = 2048) -> int:
    """Largest multiple of 128 that divides out_pad and is <= max_tile_n."""
    if out_pad <= max_tile_n:
        return out_pad
    t = (max_tile_n // 128) * 128
    while t > 128 and out_pad % t != 0:
        t -= 128
    return t


# ---------------------------------------------------------------------------
# Pallas kernel: fused MLP (Linear -> ReLU -> ... -> Linear) for one
# (batch tile, output-column tile) grid step.
# ---------------------------------------------------------------------------
def _make_mlp_kernel(num_linear: int):
    """kernel(x, w0, b0, ..., w_last, b_last, out, h_scratch).

    Hidden layers run once per batch tile (n == 0) into a bf16 VMEM scratch;
    the final layer is N-tiled so only a (last_in, tile_n) weight slab and a
    (tile_b, tile_n) output tile are live per grid step.
    """

    def kernel(*refs):
        x_ref = refs[0]
        out_ref = refs[-2]
        h_ref = refs[-1]                                      # bf16 VMEM scratch

        @pl.when(pl.program_id(1) == 0)
        def _():
            h = x_ref[...]                                    # bf16 (tile_b, in_pad)
            for i in range(num_linear - 1):                   # hidden layers
                w_ref = refs[1 + 2 * i]                       # bf16, VMEM-resident
                b_ref = refs[2 + 2 * i]                       # f32 (1, out_p)
                a = jnp.dot(h, w_ref[...],
                            preferred_element_type=jnp.float32) + b_ref[...]
                h = jnp.maximum(a, 0.0).astype(jnp.bfloat16)  # ReLU, bf16 for MXU
            h_ref[...] = h

        w_last = refs[2 * num_linear - 1]                     # (last_in, tile_n) bf16
        b_last = refs[2 * num_linear]                         # (1, tile_n) f32
        out_ref[...] = (jnp.dot(h_ref[...], w_last[...],
                                preferred_element_type=jnp.float32)
                        + b_last[...]).astype(out_ref.dtype)

    return kernel


def _mlp_pallas(x, weights, biases, out_pad, tile_b, tile_n, out_dtype):
    """Full MLP over a (b_pad, in_pad) bf16 batch; grid = (batch tiles, N tiles)."""
    b_pad, in_pad = x.shape
    num_linear = len(weights)
    last_in = weights[-1].shape[0]
    out_bytes = jnp.dtype(out_dtype).itemsize

    flat_inputs = [x]
    in_specs = [pl.BlockSpec((tile_b, in_pad), lambda b, n: (b, 0))]
    for i, (w, bias) in enumerate(zip(weights, biases)):
        flat_inputs += [w, bias]
        if i < num_linear - 1:
            # Constant index map -> fetched once, VMEM-resident across grid steps.
            in_specs.append(pl.BlockSpec(w.shape, lambda b, n: (0, 0)))
            in_specs.append(pl.BlockSpec(bias.shape, lambda b, n: (0, 0)))
        else:
            # Final layer is N-tiled: only one (last_in, tile_n) slab live at a time.
            in_specs.append(pl.BlockSpec((last_in, tile_n), lambda b, n: (0, n)))
            in_specs.append(pl.BlockSpec((1, tile_n), lambda b, n: (0, n)))

    # VMEM budget: resident hidden weights/biases (x2, conservatively assuming
    # double-buffering), double-buffered x / final-weight-slab / bias-slab /
    # output tiles, the bf16 hidden scratch, +25% headroom.
    resident = (sum(w.size * w.dtype.itemsize for w in weights[:-1])
                + sum(b.size * b.dtype.itemsize for b in biases[:-1]))
    per_step = (tile_b * in_pad * 2            # x tile (bf16)
                + last_in * tile_n * 2         # final weight slab (bf16)
                + 8 * tile_n * 4               # final bias slab (f32, sublane-padded)
                + tile_b * tile_n * out_bytes)  # output tile
    scratch = tile_b * last_in * 2
    vmem_limit = int((2 * resident + 2 * per_step + scratch) * 1.25)
    vmem_limit = max(32 << 20, min(vmem_limit, 120 << 20))

    return pl.pallas_call(
        _make_mlp_kernel(num_linear),
        out_shape=jax.ShapeDtypeStruct((b_pad, out_pad), out_dtype),
        grid_spec=pltpu.PrefetchScalarGridSpec(
            num_scalar_prefetch=0,
            grid=(b_pad // tile_b, out_pad // tile_n),
            in_specs=in_specs,
            out_specs=pl.BlockSpec((tile_b, tile_n), lambda b, n: (b, n)),
            scratch_shapes=[pltpu.VMEM((tile_b, last_in), jnp.bfloat16)]),
        compiler_params=pltpu.CompilerParams(
            # batch tiles may split across TCs (v7x); N axis is sequential so the
            # hidden-activation scratch computed at n==0 is valid for all N slabs.
            dimension_semantics=("parallel", "arbitrary"),
            vmem_limit_bytes=vmem_limit),
    )(*flat_inputs)


# ---------------------------------------------------------------------------
# Whole forward (pallas MLP + reshape glue) as one jittable function.
# ---------------------------------------------------------------------------
def _forward_impl(latents2d, weights, biases, *, max_tile_b, in_pad, out_pad,
                  tile_n, output_size, num_layers, width,
                  modulate_scale, modulate_shift, out_dtype):
    bsz, latent_dim = latents2d.shape
    # Adaptive batch tile: big enough to feed the MXU, capped at ~ceil(B/2) so
    # modest batches still produce >=2 batch-grid steps (v7x: 2 TensorCores),
    # multiple of 16 for bf16 sublane packing.
    tile_b = min(max_tile_b, max(16, _round_up(-(-bsz // 2), 16)))
    b_pad = _round_up(max(bsz, 1), tile_b)

    x = latents2d.astype(jnp.bfloat16)       # bf16 into the kernel: half the input DMA
    pad_r, pad_c = b_pad - bsz, in_pad - latent_dim
    if pad_r or pad_c:
        x = jnp.pad(x, ((0, pad_r), (0, pad_c)))   # zero-pad rows + K dim (exact math)

    mod = _mlp_pallas(x, list(weights), list(biases), out_pad, tile_b, tile_n, out_dtype)
    mod = mod[:bsz, :output_size]                               # strip padding

    mpu = int(modulate_scale) + int(modulate_shift)
    mod = mod.reshape(bsz, num_layers, mpu, width)

    outputs = {}
    for i in range(num_layers):
        single = {}
        j = 0
        if modulate_scale:
            single['scale'] = mod[:, i, j, :]                   # '+1' folded into bias
            j += 1
        if modulate_shift:
            single['shift'] = mod[:, i, j, :]
        outputs[i] = single
    return outputs


# ---------------------------------------------------------------------------
# LatentToModulation module.
# ---------------------------------------------------------------------------
class LatentToModulation:
    def __init__(self, latent_dim, layer_sizes, width, num_modulation_layers,
                 modulate_scale=True, modulate_shift=True, key=None,
                 max_tile_b=256, max_tile_n=2048, out_dtype=jnp.float32):
        # max_tile_b: 256 for v6e/v7x (256-row MXU); use 128 on v5e.
        # out_dtype:  jnp.bfloat16 halves the output writeback (useful on v5e).
        assert modulate_scale or modulate_shift
        self.latent_dim = latent_dim
        self.layer_sizes = layer_sizes
        self.width = width
        self.num_modulation_layers = num_modulation_layers
        self.modulate_scale = modulate_scale
        self.modulate_shift = modulate_shift
        self.modulations_per_unit = int(modulate_scale) + int(modulate_shift)
        self.modulations_per_layer = width * self.modulations_per_unit
        self.output_size = num_modulation_layers * self.modulations_per_layer
        self.max_tile_b = max_tile_b
        self.out_dtype = out_dtype

        if layer_sizes is None or len(layer_sizes) == 0:
            all_sizes = (latent_dim, self.output_size)
        else:
            all_sizes = (latent_dim,) + tuple(layer_sizes) + (self.output_size,)

        # Deterministic init mimicking torch.nn.Linear (U[-1/sqrt(fan_in), +1/sqrt(fan_in)]).
        if key is None:
            key = jax.random.PRNGKey(0)
        self.params = []                                        # original f32 params (reference)
        for i in range(len(all_sizes) - 1):
            in_dim, out_dim = all_sizes[i], all_sizes[i + 1]
            key, kw, kb = jax.random.split(key, 3)
            bound = 1.0 / math.sqrt(in_dim)
            w = jax.random.uniform(kw, (in_dim, out_dim), jnp.float32, -bound, bound)
            b = jax.random.uniform(kb, (out_dim,), jnp.float32, -bound, bound)
            self.params.append((w, b))

        # '+1' for scale slots folded into the last-layer bias.
        if modulate_scale and modulate_shift:
            unit = jnp.concatenate([jnp.ones((width,), jnp.float32),
                                    jnp.zeros((width,), jnp.float32)])
            scale_mask = jnp.tile(unit, num_modulation_layers)
        elif modulate_scale:
            scale_mask = jnp.ones((self.output_size,), jnp.float32)
        else:
            scale_mask = jnp.zeros((self.output_size,), jnp.float32)

        # Kernel-side params: every dim (including latent_dim) padded to a
        # 128-multiple for lane-dense DMA / MXU feed; bf16 weights, f32 biases.
        padded_sizes = [_round_up(s, 128) for s in all_sizes]
        self._in_pad = padded_sizes[0]
        self._out_pad = padded_sizes[-1]
        self._tile_n = _pick_tile_n(self._out_pad, max_tile_n)

        self._kernel_ws = []
        self._kernel_bs = []
        last = len(self.params) - 1
        for i, (w, b) in enumerate(self.params):
            in_p, out_p = padded_sizes[i], padded_sizes[i + 1]
            wk = jnp.zeros((in_p, out_p), jnp.float32)
            wk = wk.at[:w.shape[0], :w.shape[1]].set(w)
            b_eff = b + scale_mask if i == last else b
            bk = jnp.zeros((1, out_p), jnp.float32)
            bk = bk.at[0, :b.shape[0]].set(b_eff)
            self._kernel_ws.append(wk.astype(jnp.bfloat16))
            self._kernel_bs.append(bk)

        self._jit_forward = jax.jit(partial(
            _forward_impl,
            max_tile_b=self.max_tile_b, in_pad=self._in_pad, out_pad=self._out_pad,
            tile_n=self._tile_n, output_size=self.output_size,
            num_layers=num_modulation_layers, width=width,
            modulate_scale=modulate_scale, modulate_shift=modulate_shift,
            out_dtype=out_dtype))

    def __call__(self, latent):
        """latent: (latent_dim,) -> dicts of (width,) arrays (original semantics),
        or (B, latent_dim) -> dicts of (B, width) arrays (batched extension)."""
        squeeze = (latent.ndim == 1)
        lat2d = latent.reshape(1, self.latent_dim) if squeeze else latent
        out = self._jit_forward(lat2d, tuple(self._kernel_ws), tuple(self._kernel_bs))
        if squeeze:
            out = jax.tree_util.tree_map(lambda a: a[0], out)
        return out


# ---------------------------------------------------------------------------
# Pure-JAX reference (same bf16 weight / bf16 matmul-input rounding as kernel).
# ---------------------------------------------------------------------------
def _ref_mlp(x, params):
    h = x
    for i, (w, b) in enumerate(params):
        h = jnp.dot(h.astype(jnp.bfloat16).astype(jnp.float32),
                    w.astype(jnp.bfloat16).astype(jnp.float32)) + b
        if i < len(params) - 1:
            h = jnp.maximum(h, 0.0)
    return h


if __name__ == "__main__":
    latent_dim = 32
    layer_sizes = (64,)
    width = 32
    num_modulation_layers = 3
    batch = 16

    module = LatentToModulation(latent_dim, layer_sizes, width,
                                num_modulation_layers,
                                modulate_scale=True, modulate_shift=True,
                                key=jax.random.PRNGKey(0))

    key = jax.random.PRNGKey(0)
    latents = jax.random.normal(key, (batch, latent_dim), jnp.float32)

    # Batched call (grid over batch tiles x output-column tiles).
    outputs = module(latents)
    outputs = jax.block_until_ready(outputs)

    # Unbatched call (matches the original PyTorch forward exactly).
    single_out = module(latents[0])
    single_out = jax.block_until_ready(single_out)

    # Correctness check against the pure-JAX reference.
    ref_mod = _ref_mlp(latents, module.params)                  # (batch, output_size)
    ok = True
    for i in range(num_modulation_layers):
        start = 2 * width * i
        ref_scale = ref_mod[:, start:start + width] + 1
        ref_shift = ref_mod[:, start + width:start + 2 * width]
        ok &= bool(jnp.allclose(outputs[i]['scale'], ref_scale, atol=1e-3, rtol=1e-3))
        ok &= bool(jnp.allclose(outputs[i]['shift'], ref_shift, atol=1e-3, rtol=1e-3))
        ok &= bool(jnp.allclose(single_out[i]['scale'], ref_scale[0], atol=1e-3, rtol=1e-3))
        ok &= bool(jnp.allclose(single_out[i]['shift'], ref_shift[0], atol=1e-3, rtol=1e-3))
        ok &= (single_out[i]['scale'].shape == (width,))

    if ok:
        print("KERNEL_OK")
    else:
        print("MISMATCH")
</pallas_src>

<mosaic_0001>
module attributes {stable_mosaic.version = 11 : i64} {
  func.func @kernel(%arg0: i32, %arg1: i32, %arg2: memref<16x128xbf16, #tpu.memory_space<vmem>>, %arg3: memref<128x128xbf16, #tpu.memory_space<vmem>>, %arg4: memref<1x128xf32, #tpu.memory_space<vmem>>, %arg5: memref<128x256xbf16, #tpu.memory_space<vmem>>, %arg6: memref<1x256xf32, #tpu.memory_space<vmem>>, %arg7: memref<16x256xf32, #tpu.memory_space<vmem>>, %arg8: memref<16x128xbf16, #tpu.memory_space<vmem>>) attributes {dimension_semantics = [#tpu.dimension_semantics<parallel>, #tpu.dimension_semantics<arbitrary>], iteration_bounds = array<i64: 1, 1>, scalar_prefetch = 0 : i64, scratch_operands = 1 : i64, tpu.core_type = #tpu.core_type<tc>, window_params = [{transform_indices = @transform_0, window_bounds = array<i64: 16, 128>}, {pipeline_mode = #tpu.pipeline_mode<synchronous>, transform_indices = @transform_1, window_bounds = array<i64: 128, 128>}, {pipeline_mode = #tpu.pipeline_mode<synchronous>, transform_indices = @transform_2, window_bounds = array<i64: 1, 128>}, {transform_indices = @transform_3, window_bounds = array<i64: 128, 256>}, {transform_indices = @transform_4, window_bounds = array<i64: 1, 256>}, {transform_indices = @transform_5, window_bounds = array<i64: 16, 256>}]} {
    %c0_i32 = arith.constant 0 : i32
    %0 = arith.cmpi eq, %arg1, %c0_i32 : i32
    %1 = arith.extui %0 : i1 to i32
    %c0_i32_0 = arith.constant 0 : i32
    %2 = arith.cmpi ne, %1, %c0_i32_0 : i32
    scf.if %2 {
      %c0_8 = arith.constant 0 : index
      %c0_9 = arith.constant 0 : index
      %10 = vector.load %arg2[%c0_8, %c0_9] : memref<16x128xbf16, #tpu.memory_space<vmem>>, vector<16x128xbf16>
      %c0_10 = arith.constant 0 : index
      %c0_11 = arith.constant 0 : index
      %11 = vector.load %arg3[%c0_10, %c0_11] : memref<128x128xbf16, #tpu.memory_space<vmem>>, vector<128x128xbf16>
      %cst_12 = arith.constant dense<0.000000e+00> : vector<16x128xf32>
      %12 = tpu.matmul %10, %11, %cst_12 {dimension_numbers = #tpu.dot_dimension_numbers<[1], [0], [0], [1], [0, 0, 1, 1], [], []>} : vector<16x128xbf16>, vector<128x128xbf16>, vector<16x128xf32> -> vector<16x128xf32>
      %c0_13 = arith.constant 0 : index
      %c0_14 = arith.constant 0 : index
      %13 = vector.load %arg4[%c0_13, %c0_14] : memref<1x128xf32, #tpu.memory_space<vmem>>, vector<1x128xf32>
      %14 = vector.broadcast %13 : vector<1x128xf32> to vector<16x128xf32>
      %15 = arith.addf %12, %14 : vector<16x128xf32>
      %cst_15 = arith.constant 0.000000e+00 : f32
      %16 = vector.broadcast %cst_15 : f32 to vector<16x128xf32>
      %17 = arith.maximumf %15, %16 : vector<16x128xf32>
      %18 = arith.truncf %17 : vector<16x128xf32> to vector<16x128xbf16>
      %c0_16 = arith.constant 0 : index
      %c0_17 = arith.constant 0 : index
      %19 = vector.load %arg8[%c0_16, %c0_17] : memref<16x128xbf16, #tpu.memory_space<vmem>>, vector<16x128xbf16>
      tpu.vector_store %arg8[%c0_16, %c0_17], %18 {strides = array<i32>} : memref<16x128xbf16, #tpu.memory_space<vmem>>, vector<16x128xbf16>,
    } else {
    }
    %c0 = arith.constant 0 : index
    %c0_1 = arith.constant 0 : index
    %3 = vector.load %arg8[%c0, %c0_1] : memref<16x128xbf16, #tpu.memory_space<vmem>>, vector<16x128xbf16>
    %c0_2 = arith.constant 0 : index
    %c0_3 = arith.constant 0 : index
    %4 = vector.load %arg5[%c0_2, %c0_3] : memref<128x256xbf16, #tpu.memory_space<vmem>>, vector<128x256xbf16>
    %cst = arith.constant dense<0.000000e+00> : vector<16x256xf32>
    %5 = tpu.matmul %3, %4, %cst {dimension_numbers = #tpu.dot_dimension_numbers<[1], [0], [0], [1], [0, 0, 1, 1], [], []>} : vector<16x128xbf16>, vector<128x256xbf16>, vector<16x256xf32> -> vector<16x256xf32>
    %c0_4 = arith.constant 0 : index
    %c0_5 = arith.constant 0 : index
    %6 = vector.load %arg6[%c0_4, %c0_5] : memref<1x256xf32, #tpu.memory_space<vmem>>, vector<1x256xf32>
    %7 = vector.broadcast %6 : vector<1x256xf32> to vector<16x256xf32>
    %8 = arith.addf %5, %7 : vector<16x256xf32>
    %c0_6 = arith.constant 0 : index
    %c0_7 = arith.constant 0 : index
    %9 = vector.load %arg7[%c0_6, %c0_7] : memref<16x256xf32, #tpu.memory_space<vmem>>, vector<16x256xf32>
    tpu.vector_store %arg7[%c0_6, %c0_7], %8 {strides = array<i32>} : memref<16x256xf32, #tpu.memory_space<vmem>>, vector<16x256xf32>,
    return
  }
  func.func @transform_0(%arg0: i32, %arg1: i32) -> (i32, i32) {
    %c0_i32 = arith.constant 0 : i32
    %c0_i32_0 = arith.constant 0 : i32
    return %arg0, %c0_i32 : i32, i32
  }
  func.func @transform_1(%arg0: i32, %arg1: i32) -> (i32, i32) {
    %c0_i32 = arith.constant 0 : i32
    %c0_i32_0 = arith.constant 0 : i32
    %c0_i32_1 = arith.constant 0 : i32
    return %c0_i32, %c0_i32_0 : i32, i32
  }
  func.func @transform_2(%arg0: i32, %arg1: i32) -> (i32, i32) {
    %c0_i32 = arith.constant 0 : i32
    %c0_i32_0 = arith.constant 0 : i32
    %c0_i32_1 = arith.constant 0 : i32
    return %c0_i32, %c0_i32_0 : i32, i32
  }
  func.func @transform_3(%arg0: i32, %arg1: i32) -> (i32, i32) {
    %c0_i32 = arith.constant 0 : i32
    %c0_i32_0 = arith.constant 0 : i32
    return %c0_i32, %arg1 : i32, i32
  }
  func.func @transform_4(%arg0: i32, %arg1: i32) -> (i32, i32) {
    %c0_i32 = arith.constant 0 : i32
    %c0_i32_0 = arith.constant 0 : i32
    return %c0_i32, %arg1 : i32, i32
  }
  func.func @transform_5(%arg0: i32, %arg1: i32) -> (i32, i32) {
    %c0_i32 = arith.constant 0 : i32
    return %arg0, %arg1 : i32, i32
  }
}

</mosaic_0001>

<bundles_post_ra>
// kernel: _forward_impl.1
= control target key start
LH: loop header
LB: loop body
LE: loop exit
PB: predicated region body
PF: predicated region fallthrough
CT: control target
= control target key end

     0   :  { %10 = vsyncpa [#allocation4], 0  ;;  %s568_s0 = inlined_call_operand.vmem [shape: bf16[16,128], index: 0, kind: input, shape index: {}]   ;;  %s569_s1 = inlined_call_operand.hbm [shape: bf16[128,128], index: 1, kind: input, shape index: {}]   ;;  %s570_s2 = inlined_call_operand.vmem [shape: f32[1,128], index: 2, kind: input, shape index: {}]   ;;  %s571_s3 = inlined_call_operand.hbm [shape: bf16[128,256], index: 3, kind: input, shape index: {}]   ;;  %s572_s4 = inlined_call_operand.vmem [shape: f32[1,256], index: 4, kind: input, shape index: {}]   ;;  %s573_s5 = inlined_call_operand.vmem [shape: f32[16,256], index: 5, kind: output, shape index: {}]  }
   0x1   :  { %11 = vsyncpa [#allocation6], 0  ;;  %s484_s18 = smov [#allocation3]   ;;  %s436_s22 = scalar_lea.hbm %s569_s1, 1024 }
   0x2   :  { %s19_s19 = sshll.u32 %s484_s18, 4  ;;  %p437_p0 = scmp.ne.s32.totalorder %s569_s1, %s436_s22  ;;  %s20_s19 = int_to_ptr.vmem [resolvable:$true] %s19_s19 }
   0x3   :  { %p440_p1 = scmp.lt.u32.totalorder %s436_s22, %s569_s1 }
   0x5   :  { %p442_p2 = pnand %p440_p1, %p437_p0 }
   0x7   :  { %445 = shalt.err (!%p442_p2)
}
   0x8   :  { %s446_s27 = scalar_lea.vmem %s20_s19, 1024  ;;  %p451_p4 = scmp.lt.s32.totalorder %s20_s19, %s20_s19 }
   0x9   :  { %p447_p3 = scmp.ne.s32.totalorder %s20_s19, %s446_s27  ;;  %p452_p5 = scmp.lt.s32.totalorder %s446_s27, %s446_s27 }
   0xb   :  { %p453_p6 = por %p452_p5, %p451_p4 }
   0xd   :  { %p454_p7 = pnand %p453_p6, %p447_p3 }
   0xf   :  { %457 = shalt.err (!%p454_p7)
}
  0x10   :  { %s485_s28 = smov 64   ;;  %s486_s29 = smov 4  }
  0x11   :  { %25 = dma.hbm_to_vmem [thread:$0]  %s569_s1, 1024, %s20_s19, [#allocation4], %s485_s28, %s485_s28, %s486_s29  }
  0x12   :  { %s487_s7 = smov [#allocation5]   ;;  %s458_s11 = scalar_lea.hbm %s571_s3, 2048 }
  0x13   :  { %s33_s8 = sshll.u32 %s487_s7, 4  ;;  %p459_p8 = scmp.ne.s32.totalorder %s571_s3, %s458_s11  ;;  %s34_s8 = int_to_ptr.vmem [resolvable:$true] %s33_s8 }
  0x14   :  { %p462_p9 = scmp.lt.u32.totalorder %s458_s11, %s571_s3 }
  0x16   :  { %p464_p10 = pnand %p462_p9, %p459_p8 }
  0x18   :  { %467 = shalt.err (!%p464_p10)
}
  0x19   :  { %s468_s16 = scalar_lea.vmem %s34_s8, 2048  ;;  %p473_p12 = scmp.lt.s32.totalorder %s34_s8, %s34_s8 }
  0x1a   :  { %p469_p11 = scmp.ne.s32.totalorder %s34_s8, %s468_s16  ;;  %p474_p13 = scmp.lt.s32.totalorder %s468_s16, %s468_s16 }
  0x1c   :  { %p475_p0 = por %p474_p13, %p473_p12 }
  0x1e   :  { %p476_p1 = pnand %p475_p0, %p469_p11 }
  0x20   :  { %479 = shalt.err (!%p476_p1)
}
  0x21   :  { %s488_s1 = smov 128   ;;  %s489_s17 = smov 8  }
  0x22   :  { %39 = dma.hbm_to_vmem [thread:$0]  %s571_s3, 2048, %s34_s8, [#allocation6], %s488_s1, %s488_s1, %s489_s17  }
  0x23   :  { %480 = dma.done.wait [#allocation4], 1024  }
  0x24   :  { %481 = vsyncadd [#allocation4], 4294966272 }
  0x25   :  { %482 = dma.done.wait [#allocation6], 2048  }
  0x26   :  { %483 = vsyncadd [#allocation6], 4294965248  ;;  %v490_v0 = vmov 0.0   ;;  %vm491_vm0 = vmmov 0   ;;  %v403_v1 = vld [vmem:[#allocation3] sm:$0xff]   ;;  %v404_v2 = vld [vmem:[#allocation3 + $0x8] sm:$0xff]   ;;  %v196_v37 = vlaneseq }
  0x27   :  { %374 = vmatprep.subr.bf16.mxu0 %v490_v0  ;;  %390 = vmatprep.mubr.msk.bf16.mxu0 %vm491_vm0, %v490_v0  ;;  %v405_v3 = vld [vmem:[#allocation3 + $0x10] sm:$0xff]   ;;  %v406_v4 = vld [vmem:[#allocation3 + $0x18] sm:$0xff]   ;;  %v412_v5 = vld [vmem:[#allocation5 + $0x4] ss:$8 sps:$4 sm:$0xff]   ;;  %v492_v26 = vmov 0  }
  0x28   :  { %375 = vmatpush3.bf16.msra.mxu0 %v403_v1  ;;  %v414_v6 = vld [vmem:[#allocation5] ss:$8 sps:$4 sm:$0xff]   ;;  %286 = vmatprep.subr.bf16.mxu1 %v412_v5  ;;  %v415_v7 = vld [vmem:[#allocation5 + $0x14] ss:$8 sps:$4 sm:$0xff]   ;;  %v417_v8 = vld [vmem:[#allocation5 + $0x10] ss:$8 sps:$4 sm:$0xff]  }
  0x29   :  { %376 = vmatprep.subr.bf16.mxu0 %v490_v0  ;;  %287 = vmatpush1.bf16.msra.mxu1 %v414_v6  ;;  %v418_v9 = vld [vmem:[#allocation5 + $0x24] ss:$8 sps:$4 sm:$0xff]   ;;  %v420_v11 = vld [vmem:[#allocation5 + $0x20] ss:$8 sps:$4 sm:$0xff]   ;;  %v421_v12 = vld [vmem:[#allocation5 + $0x34] ss:$8 sps:$4 sm:$0xff]  }
  0x2a   :  { %288 = vmatprep.subr.bf16.mxu1 %v415_v7  ;;  %v407_v10 = vld [vmem:[#allocation3 + $0x20] sm:$0xff]   ;;  %v408_v13 = vld [vmem:[#allocation3 + $0x28] sm:$0xff]   ;;  %v423_v14 = vld [vmem:[#allocation5 + $0x30] ss:$8 sps:$4 sm:$0xff]   ;;  %318 = vmatprep.mubr.bf16.mxu1 %v492_v26  ;;  %v197_v38 = vshrl.u32 %v196_v37, 7 }
  0x2b   :  { %v424_v15 = vld [vmem:[#allocation5 + $0x44] ss:$8 sps:$4 sm:$0xff]   ;;  %v409_v16 = vld [vmem:[#allocation3 + $0x30] sm:$0xff]   ;;  %v426_v17 = vld [vmem:[#allocation5 + $0x40] ss:$8 sps:$4 sm:$0xff]  }
  0x2c   :  { %377 = vmatpush3.bf16.msra.mxu0 %v404_v2  ;;  %v427_v18 = vld [vmem:[#allocation5 + $0x54] ss:$8 sps:$4 sm:$0xff]   ;;  %v429_v20 = vld [vmem:[#allocation5 + $0x50] ss:$8 sps:$4 sm:$0xff]   ;;  %v411_v21 = vld [vmem:[%s568_s0] sm:$0xff]   ;;  %v198_v39 = vsub.s32 0, %v197_v38 }
  0x2d   :  { %378 = vmatprep.subr.bf16.mxu0 %v490_v0  ;;  %289 = vmatpush1.bf16.msra.mxu1 %v417_v8  ;;  %v410_v19 = vld [vmem:[#allocation3 + $0x38] sm:$0xff]   ;;  %v430_v22 = vld [vmem:[#allocation5 + $0x64] ss:$8 sps:$4 sm:$0xff]   ;;  %v432_v23 = vld [vmem:[#allocation5 + $0x60] ss:$8 sps:$4 sm:$0xff]   ;;  %v202_v41 = vsub.s32 1, %v197_v38 }
  0x2e   :  { %290 = vmatprep.subr.bf16.mxu1 %v418_v9  ;;  %v433_v24 = vld [vmem:[#allocation5 + $0x74] ss:$8 sps:$4 sm:$0xff]   ;;  %v435_v25 = vld [vmem:[#allocation5 + $0x70] ss:$8 sps:$4 sm:$0xff]   ;;  %v339_v27 = vld [vmem:[%s570_s2] ss:$0 sm:$0xff] }
  0x2f   :  { %v194_v40 = vld [vmem:[%s572_s4] sm:$0x3] }
  0x30   :  { %379 = vmatpush3.bf16.msra.mxu0 %v405_v3  ;;  %v199_v42 = vrot.slane %v194_v40, %v198_v39  ;;  %v203_v43 = vrot.slane %v194_v40, %v202_v41 }
  0x31   :  { %380 = vmatprep.subr.bf16.mxu0 %v490_v0  ;;  %291 = vmatpush1.bf16.msra.mxu1 %v420_v11 }
  0x32   :  { %292 = vmatprep.subr.bf16.mxu1 %v421_v12 }
  0x34   :  { %381 = vmatpush3.bf16.msra.mxu0 %v406_v4 }
  0x35   :  { %382 = vmatprep.subr.bf16.mxu0 %v490_v0  ;;  %293 = vmatpush1.bf16.msra.mxu1 %v423_v14 }
  0x36   :  { %294 = vmatprep.subr.bf16.mxu1 %v424_v15 }
  0x38   :  { %383 = vmatpush3.bf16.msra.mxu0 %v407_v10 }
  0x39   :  { %384 = vmatprep.subr.bf16.mxu0 %v490_v0  ;;  %295 = vmatpush1.bf16.msra.mxu1 %v426_v17 }
  0x3a   :  { %296 = vmatprep.subr.bf16.mxu1 %v427_v18 }
  0x3c   :  { %385 = vmatpush3.bf16.msra.mxu0 %v408_v13 }
  0x3d   :  { %386 = vmatprep.subr.bf16.mxu0 %v490_v0  ;;  %297 = vmatpush1.bf16.msra.mxu1 %v429_v20 }
  0x3e   :  { %298 = vmatprep.subr.bf16.mxu1 %v430_v22 }
  0x40   :  { %387 = vmatpush3.bf16.msra.mxu0 %v409_v16 }
  0x41   :  { %388 = vmatprep.subr.bf16.mxu0 %v490_v0  ;;  %299 = vmatpush1.bf16.msra.mxu1 %v432_v23 }
  0x42   :  { %300 = vmatprep.subr.bf16.mxu1 %v433_v24 }
  0x44   :  { %389 = vmatpush3.bf16.msra.mxu0 %v410_v19 }
  0x45   :  { %301 = vmatpush1.bf16.msra.mxu1 %v435_v25 }
  0x47   :  { %391 = vmatmul.mubr.bf16.vlgmr.msra.gmra.mrb[0].mxu0 %v411_v21 }
 0x11a   :  { %v166_v28 = vpop.f32.mrb[0].mxu0 }
 0x11b   :  { %v167_v29 = vadd.f32 %v339_v27, %v166_v28  ;;  %v392_v30 = vpop.f32.mrb[1].mxu0 }
 0x11c   :  { %v169_v31 = vpop.f32.mrb[2].mxu0 }
 0x11d   :  { %v170_v32 = vadd.f32 %v339_v27, %v169_v31  ;;  %v393_v33 = vpop.f32.mrb[3].mxu0  ;;  %v173_v34 = vmax.f32 %v167_v29, 0.0 }
 0x11f   :  { %v174_v35 = vmax.f32 %v170_v32, 0.0 }
 0x121   :  { %v175_v36 = vpack.c.bf16 %v174_v35, %v173_v34 }
 0x123   :  { %319 = vmatmul.mubr.bf16.vlgmr.msra.gmra.mrb[0].mxu1 %v175_v36 }
 0x1f6   :  { %v320_v44 = vpop.f32.mrb[0].mxu1 }
 0x1f7   :  { %v321_v45 = vadd.f32 %v320_v44, %v199_v42  ;;  %v322_v46 = vpop.f32.mrb[1].mxu1 }
 0x1f8   :  { %v323_v47 = vadd.f32 %v322_v46, %v203_v43  ;;  %v324_v48 = vpop.f32.mrb[2].mxu1 }
 0x1f9   :  { %329 = vst [vmem:[%s573_s5] sm:$0xff] %v321_v45  ;;  %v325_v49 = vadd.f32 %v324_v48, %v199_v42  ;;  %v326_v50 = vpop.f32.mrb[3].mxu1 }
 0x1fa   :  { %330 = vst [vmem:[%s573_s5 + $0x8] sm:$0xff] %v323_v47  ;;  %v327_v51 = vadd.f32 %v326_v50, %v203_v43 }
 0x1fb   :  { %331 = vst [vmem:[%s573_s5 + $0x10] sm:$0xff] %v325_v49 }
 0x1fc   :  { %332 = vst [vmem:[%s573_s5 + $0x18] sm:$0xff] %v327_v51 }
 0x1fd   :  { %337 = vsyncpa [#allocation4], 1 }
 0x1fe   :  { %338 = vsyncpa [#allocation6], 1 }

</bundles_post_ra>
